<compile_context>
chip_gen: v7x
topology: tpu7x:2x2x1
jax: 0.10.0
libtpu: 0.0.40
codegen_flags: <defaults>
</compile_context>

<pallas_src>
import numpy as np

import jax
import jax.numpy as jnp
from jax.experimental import pallas as pl
from jax.experimental.pallas import tpu as pltpu


OUT_DTYPE = jnp.bfloat16   # review: output precision is already bf16-limited


# ----------------------------- Pallas kernel --------------------------------

def _featscae_fused_kernel(x_ref,
                           w1_ref, w2_ref, w3_ref, w4_ref, w5_ref,
                           s1_ref, s2_ref, s3_ref, s4_ref, s5_ref,
                           o_ref):
    """Whole FeatSCAE chain on one (C, TS) spatial tile. Weights stay in VMEM.

    Each layer: y = W(Cout,Cin) @ h(Cin,TS) + s(Cout,1)  [+ ReLU].
    Matmuls in bf16 with f32 accumulation; shift/ReLU epilogue in f32.
    """

    def layer(h, w_ref, s_ref, relu):
        y = jnp.dot(w_ref[...], h, preferred_element_type=jnp.float32)
        y = y + s_ref[...]                      # folded bias/BN shift (Cout,1)
        if relu:
            y = jnp.maximum(y, 0.0)
        return y

    h = x_ref[...].astype(jnp.bfloat16)                          # f32 -> bf16 in-kernel
    h = layer(h, w1_ref, s1_ref, True).astype(jnp.bfloat16)      # conv1+BN+ReLU (+shuffle1 folded into w2)
    h = layer(h, w2_ref, s2_ref, True).astype(jnp.bfloat16)      # conv2+BN+ReLU (+shuffle2 folded into w23)
    h = layer(h, w3_ref, s3_ref, True).astype(jnp.bfloat16)      # mid_conv∘conv3 + BN + ReLU
    h = layer(h, w4_ref, s4_ref, True).astype(jnp.bfloat16)      # conv4+BN+ReLU (+shuffle4 folded into w5)
    o_ref[...] = layer(h, w5_ref, s5_ref, False).astype(o_ref.dtype)  # conv5
    # TODO(synk): optional v5e-only sub-chunking of the spatial tile if bundle
    # dumps ever show vector-store saturation at very large tiles.


def _pick_spatial_tile(hw, n_batch, cap=4096):
    """Pick (tile, padded_hw): tile is a multiple of 128 (or the full extent)
    that divides padded_hw; cap amortizes per-grid-step overhead while keeping
    VMEM use ~15 MiB (safe within v7x's 64 MiB physical VMEM)."""
    if hw <= cap:
        ts = hw
        # keep >= 2 total grid tiles when possible (two v7x TensorCores)
        if n_batch == 1 and hw % 256 == 0:
            ts = hw // 2
        return ts, hw
    hw_p = ((hw + 127) // 128) * 128
    ts = 128
    for t in range(128, cap + 1, 128):
        if hw_p % t == 0:
            ts = t
    return ts, hw_p


def featscae_fused_call(x3, fused):
    """x3: (N, Cin, HW) f32, NCHW viewed with flattened spatial.
    Returns (N, Cout, HW) in OUT_DTYPE."""
    n, cin, hw = x3.shape
    ws = [fused["w1"], fused["w2"], fused["w23"], fused["w4"], fused["w5"]]
    shs = [fused["s1"], fused["s2"], fused["s23"], fused["s4"], fused["s5"]]
    cout = ws[-1].shape[0]

    ts, hw_p = _pick_spatial_tile(hw, n)
    if hw_p != hw:
        x3 = jnp.pad(x3, ((0, 0), (0, 0), (0, hw_p - hw)))
    n_sp = hw_p // ts

    # Weights / shifts: full-array blocks with a constant index_map -> the
    # same VMEM-resident block for every grid step (no re-DMA).
    w_specs = [pl.BlockSpec(w.shape, lambda b, s: (0, 0)) for w in ws]
    s_specs = [pl.BlockSpec(sh.shape, lambda b, s: (0, 0)) for sh in shs]

    out = pl.pallas_call(
        _featscae_fused_kernel,
        out_shape=jax.ShapeDtypeStruct((n, cout, hw_p), OUT_DTYPE),
        grid_spec=pltpu.PrefetchScalarGridSpec(
            num_scalar_prefetch=0,
            grid=(n, n_sp),
            in_specs=[pl.BlockSpec((None, cin, ts), lambda b, s: (b, 0, s))]
                     + w_specs + s_specs,
            out_specs=pl.BlockSpec((None, cout, ts), lambda b, s: (b, 0, s)),
        ),
        compiler_params=pltpu.CompilerParams(
            dimension_semantics=("parallel", "parallel"),   # shard across TCs
            vmem_limit_bytes=48 * 1024 * 1024,              # v7x-safe budget
        ),
    )(x3, *ws, *shs)

    if hw_p != hw:
        out = out[..., :hw]        # padded spatial columns are discarded
    return out


# ------------------------- parameter construction ----------------------------

def make_dense_grouped_weight(key, cin, cout, groups, scale=0.05):
    """Grouped 1x1-conv weight expanded to a dense block-diagonal (Cin, Cout)
    matrix so rows @ W == grouped conv (dense costs the same MXU passes)."""
    in_g, out_g = cin // groups, cout // groups
    wg = jax.random.normal(key, (groups, out_g, in_g), jnp.float32) * scale
    w = jnp.zeros((cin, cout), jnp.float32)
    for g in range(groups):
        w = w.at[g * in_g:(g + 1) * in_g, g * out_g:(g + 1) * out_g].set(wg[g].T)
    return w


def make_bias(key, cout, scale=0.05):
    return jax.random.normal(key, (cout,), jnp.float32) * scale


def make_bn_params(key, c, eps=1e-5):
    """Eval-mode BatchNorm -> per-channel (bn_scale, running_mean, beta)."""
    k1, k2, k3, k4 = jax.random.split(key, 4)
    gamma = 1.0 + 0.1 * jax.random.normal(k1, (c,), jnp.float32)
    beta = 0.1 * jax.random.normal(k2, (c,), jnp.float32)
    mean = 0.1 * jax.random.normal(k3, (c,), jnp.float32)
    var = 0.9 + 0.1 * jnp.abs(jax.random.normal(k4, (c,), jnp.float32))
    bn_scale = gamma / jnp.sqrt(var + eps)
    return bn_scale, mean, beta


def init_featscae_raw_params(key, in_channels, latent_dim):
    """Raw (unfused) parameters mirroring the PyTorch module layout."""
    c, lat = in_channels, latent_dim
    c2 = (c + 2 * lat) // 2
    c2 = c2 + c2 % 4                 # conv1/conv2 width
    c4 = (c + 2 * lat) // 2          # conv4 output width (as in module)

    ks = jax.random.split(key, 16)
    raw = {}
    raw["w1"], raw["b1"], raw["bn1"] = (make_dense_grouped_weight(ks[0], c, c2, 8),
                                        make_bias(ks[1], c2), make_bn_params(ks[2], c2))
    raw["w2"], raw["b2"], raw["bn2"] = (make_dense_grouped_weight(ks[3], c2, 2 * lat, 4),
                                        make_bias(ks[4], 2 * lat), make_bn_params(ks[5], 2 * lat))
    raw["wm"], raw["bm"] = make_dense_grouped_weight(ks[6], 2 * lat, lat, 1), make_bias(ks[7], lat)
    raw["w3"], raw["b3"], raw["bn3"] = (make_dense_grouped_weight(ks[8], lat, 2 * lat, 1),
                                        make_bias(ks[9], 2 * lat), make_bn_params(ks[10], 2 * lat))
    raw["w4"], raw["b4"], raw["bn4"] = (make_dense_grouped_weight(ks[11], 2 * lat, c4, 4),
                                        make_bias(ks[12], c4), make_bn_params(ks[13], c4))
    raw["w5"], raw["b5"] = make_dense_grouped_weight(ks[14], c4, c, 8), make_bias(ks[15], c)
    return raw


def _shuffle_inv_perm(c, groups):
    """Row permutation p such that x_shuffled @ W == x @ W[p]."""
    perm = np.arange(c).reshape(groups, c // groups).T.reshape(-1)
    return np.argsort(perm)


def fuse_featscae_params(raw):
    """Fold BN+bias into (weight, shift), fold shuffles into weight rows,
    compose mid_conv with conv3, then transpose to the weight-stationary
    (Cout, Cin) convention and cast weights to bf16 for the kernel."""

    def fold(w, b, bn):
        s, m, beta = bn
        return w * s[None, :], (b - m) * s + beta

    w1, s1 = fold(raw["w1"], raw["b1"], raw["bn1"])
    w2, s2 = fold(raw["w2"], raw["b2"], raw["bn2"])
    w3, s3 = fold(raw["w3"], raw["b3"], raw["bn3"])
    w4, s4 = fold(raw["w4"], raw["b4"], raw["bn4"])
    w5, s5 = raw["w5"], raw["b5"]
    wm, bm = raw["wm"], raw["bm"]

    c2 = w1.shape[1]
    lat2 = w2.shape[1]
    c4 = w4.shape[1]

    # Channel shuffles -> input-channel permutations of the next layer's weight.
    w2 = w2[_shuffle_inv_perm(c2, 8)]      # channel_shuffle1 (groups=8)
    wm = wm[_shuffle_inv_perm(lat2, 4)]    # channel_shuffle2 (groups=4)
    w5 = w5[_shuffle_inv_perm(c4, 4)]      # channel_shuffle4 (groups=4)

    # mid_conv has no BN/ReLU -> compose linearly with conv3.
    w23 = wm @ w3                          # (2*lat, 2*lat)
    s23 = bm @ w3 + s3

    # Weight-stationary: y = Wt(Cout,Cin) @ x(Cin,S) + shift(Cout,1).
    wt = lambda a: a.T.astype(jnp.bfloat16)
    col = lambda a: a.reshape(-1, 1).astype(jnp.float32)
    return {
        "w1": wt(w1), "s1": col(s1),
        "w2": wt(w2), "s2": col(s2),
        "w23": wt(w23), "s23": col(s23),
        "w4": wt(w4), "s4": col(s4),
        "w5": wt(w5), "s5": col(s5),
    }


# ------------------------------- forward pass ---------------------------------

def featscae_forward(fused, x_nchw):
    n, c, h, w = x_nchw.shape
    x3 = x_nchw.reshape(n, c, h * w)            # free view: spatial on lanes
    out3 = featscae_fused_call(x3, fused)       # (N, C, HW) in OUT_DTYPE
    return out3.reshape(n, -1, h, w)            # free view back to NCHW


# --------------------------- pure-JAX f32 reference ---------------------------

def channel_shuffle_rows(rows, groups):
    r, c = rows.shape
    return rows.reshape(r, groups, c // groups).transpose(0, 2, 1).reshape(r, c)


def featscae_reference(raw, x_nchw):
    """Original module semantics (eval mode), f32, no fusion."""
    n, c, h, w = x_nchw.shape
    rows = x_nchw.transpose(0, 2, 3, 1).reshape(n * h * w, c)

    def conv_bn_relu(r, wt, b, bn):
        y = r @ wt + b
        s, m, beta = bn
        return jnp.maximum((y - m) * s + beta, 0.0)

    rows = conv_bn_relu(rows, raw["w1"], raw["b1"], raw["bn1"])
    rows = channel_shuffle_rows(rows, 8)
    rows = conv_bn_relu(rows, raw["w2"], raw["b2"], raw["bn2"])
    rows = channel_shuffle_rows(rows, 4)
    rows = rows @ raw["wm"] + raw["bm"]
    rows = conv_bn_relu(rows, raw["w3"], raw["b3"], raw["bn3"])
    rows = conv_bn_relu(rows, raw["w4"], raw["b4"], raw["bn4"])
    rows = channel_shuffle_rows(rows, 4)
    rows = rows @ raw["w5"] + raw["b5"]
    return rows.reshape(n, h, w, c).transpose(0, 3, 1, 2)


# ---------------------------------- main ---------------------------------------

if __name__ == "__main__":
    # Small shapes satisfying FeatSCAE divisibility constraints
    # (in_channels % 8 == 0, latent_dim even, derived widths divisible by 4/8).
    B, C, H, W = 2, 128, 16, 16
    LATENT = 16

    key = jax.random.PRNGKey(0)
    k_params, k_x = jax.random.split(key)
    raw = init_featscae_raw_params(k_params, in_channels=C, latent_dim=LATENT)
    fused = fuse_featscae_params(raw)
    x = jax.random.normal(k_x, (B, C, H, W), jnp.float32)

    y = jax.jit(featscae_forward)(fused, x)
    y = jax.block_until_ready(y)
    assert y.shape == (B, C, H, W), y.shape

    # Tolerance check vs. unfused f32 reference (bf16 matmuls/output -> not bit-exact).
    y_ref = featscae_reference(raw, x)
    err = float(jnp.max(jnp.abs(y.astype(jnp.float32) - y_ref)))
    assert err < 5e-2, f"max abs err {err}"
    print("KERNEL_OK")
</pallas_src>

<mosaic_0001>
module attributes {stable_mosaic.version = 11 : i64} {
  func.func @_featscae_fused_kernel(%arg0: i32, %arg1: i32, %arg2: memref<1x128x256xf32, #tpu.memory_space<vmem>>, %arg3: memref<80x128xbf16, #tpu.memory_space<vmem>>, %arg4: memref<32x80xbf16, #tpu.memory_space<vmem>>, %arg5: memref<32x32xbf16, #tpu.memory_space<vmem>>, %arg6: memref<80x32xbf16, #tpu.memory_space<vmem>>, %arg7: memref<128x80xbf16, #tpu.memory_space<vmem>>, %arg8: memref<80x1xf32, #tpu.memory_space<vmem>>, %arg9: memref<32x1xf32, #tpu.memory_space<vmem>>, %arg10: memref<32x1xf32, #tpu.memory_space<vmem>>, %arg11: memref<80x1xf32, #tpu.memory_space<vmem>>, %arg12: memref<128x1xf32, #tpu.memory_space<vmem>>, %arg13: memref<1x128x256xbf16, #tpu.memory_space<vmem>>) attributes {dimension_semantics = [#tpu.dimension_semantics<parallel>, #tpu.dimension_semantics<parallel>], iteration_bounds = array<i64: 2, 1>, scalar_prefetch = 0 : i64, scratch_operands = 0 : i64, tpu.core_type = #tpu.core_type<tc>, window_params = [{transform_indices = @transform_0, window_bounds = array<i64: 1, 128, 256>}, {pipeline_mode = #tpu.pipeline_mode<synchronous>, transform_indices = @transform_1, window_bounds = array<i64: 80, 128>}, {pipeline_mode = #tpu.pipeline_mode<synchronous>, transform_indices = @transform_2, window_bounds = array<i64: 32, 80>}, {pipeline_mode = #tpu.pipeline_mode<synchronous>, transform_indices = @transform_3, window_bounds = array<i64: 32, 32>}, {pipeline_mode = #tpu.pipeline_mode<synchronous>, transform_indices = @transform_4, window_bounds = array<i64: 80, 32>}, {pipeline_mode = #tpu.pipeline_mode<synchronous>, transform_indices = @transform_5, window_bounds = array<i64: 128, 80>}, {pipeline_mode = #tpu.pipeline_mode<synchronous>, transform_indices = @transform_6, window_bounds = array<i64: 80, 1>}, {pipeline_mode = #tpu.pipeline_mode<synchronous>, transform_indices = @transform_7, window_bounds = array<i64: 32, 1>}, {pipeline_mode = #tpu.pipeline_mode<synchronous>, transform_indices = @transform_8, window_bounds = array<i64: 32, 1>}, {pipeline_mode = #tpu.pipeline_mode<synchronous>, transform_indices = @transform_9, window_bounds = array<i64: 80, 1>}, {pipeline_mode = #tpu.pipeline_mode<synchronous>, transform_indices = @transform_10, window_bounds = array<i64: 128, 1>}, {transform_indices = @transform_11, window_bounds = array<i64: 1, 128, 256>}]} {
    %c0 = arith.constant 0 : index
    %c0_0 = arith.constant 0 : index
    %c0_1 = arith.constant 0 : index
    %0 = vector.load %arg2[%c0, %c0_0, %c0_1] : memref<1x128x256xf32, #tpu.memory_space<vmem>>, vector<1x128x256xf32>
    %1 = vector.shape_cast %0 : vector<1x128x256xf32> to vector<128x256xf32>
    %2 = arith.truncf %1 : vector<128x256xf32> to vector<128x256xbf16>
    %c0_2 = arith.constant 0 : index
    %c0_3 = arith.constant 0 : index
    %3 = vector.load %arg3[%c0_2, %c0_3] : memref<80x128xbf16, #tpu.memory_space<vmem>>, vector<80x128xbf16>
    %cst = arith.constant dense<0.000000e+00> : vector<80x256xf32>
    %4 = tpu.matmul %3, %2, %cst {dimension_numbers = #tpu.dot_dimension_numbers<[1], [0], [0], [1], [0, 0, 1, 1], [], []>} : vector<80x128xbf16>, vector<128x256xbf16>, vector<80x256xf32> -> vector<80x256xf32>
    %c0_4 = arith.constant 0 : index
    %c0_5 = arith.constant 0 : index
    %5 = vector.load %arg8[%c0_4, %c0_5] : memref<80x1xf32, #tpu.memory_space<vmem>>, vector<80x1xf32>
    %6 = vector.broadcast %5 : vector<80x1xf32> to vector<80x256xf32>
    %7 = arith.addf %4, %6 : vector<80x256xf32>
    %cst_6 = arith.constant 0.000000e+00 : f32
    %8 = vector.broadcast %cst_6 : f32 to vector<80x256xf32>
    %9 = arith.maximumf %7, %8 : vector<80x256xf32>
    %10 = arith.truncf %9 : vector<80x256xf32> to vector<80x256xbf16>
    %c0_7 = arith.constant 0 : index
    %c0_8 = arith.constant 0 : index
    %11 = vector.load %arg4[%c0_7, %c0_8] : memref<32x80xbf16, #tpu.memory_space<vmem>>, vector<32x80xbf16>
    %cst_9 = arith.constant dense<0.000000e+00> : vector<32x256xf32>
    %12 = tpu.matmul %11, %10, %cst_9 {dimension_numbers = #tpu.dot_dimension_numbers<[1], [0], [0], [1], [0, 0, 1, 1], [], []>} : vector<32x80xbf16>, vector<80x256xbf16>, vector<32x256xf32> -> vector<32x256xf32>
    %c0_10 = arith.constant 0 : index
    %c0_11 = arith.constant 0 : index
    %13 = vector.load %arg9[%c0_10, %c0_11] : memref<32x1xf32, #tpu.memory_space<vmem>>, vector<32x1xf32>
    %14 = vector.broadcast %13 : vector<32x1xf32> to vector<32x256xf32>
    %15 = arith.addf %12, %14 : vector<32x256xf32>
    %cst_12 = arith.constant 0.000000e+00 : f32
    %16 = vector.broadcast %cst_12 : f32 to vector<32x256xf32>
    %17 = arith.maximumf %15, %16 : vector<32x256xf32>
    %18 = arith.truncf %17 : vector<32x256xf32> to vector<32x256xbf16>
    %c0_13 = arith.constant 0 : index
    %c0_14 = arith.constant 0 : index
    %19 = vector.load %arg5[%c0_13, %c0_14] : memref<32x32xbf16, #tpu.memory_space<vmem>>, vector<32x32xbf16>
    %cst_15 = arith.constant dense<0.000000e+00> : vector<32x256xf32>
    %20 = tpu.matmul %19, %18, %cst_15 {dimension_numbers = #tpu.dot_dimension_numbers<[1], [0], [0], [1], [0, 0, 1, 1], [], []>} : vector<32x32xbf16>, vector<32x256xbf16>, vector<32x256xf32> -> vector<32x256xf32>
    %c0_16 = arith.constant 0 : index
    %c0_17 = arith.constant 0 : index
    %21 = vector.load %arg10[%c0_16, %c0_17] : memref<32x1xf32, #tpu.memory_space<vmem>>, vector<32x1xf32>
    %22 = vector.broadcast %21 : vector<32x1xf32> to vector<32x256xf32>
    %23 = arith.addf %20, %22 : vector<32x256xf32>
    %cst_18 = arith.constant 0.000000e+00 : f32
    %24 = vector.broadcast %cst_18 : f32 to vector<32x256xf32>
    %25 = arith.maximumf %23, %24 : vector<32x256xf32>
    %26 = arith.truncf %25 : vector<32x256xf32> to vector<32x256xbf16>
    %c0_19 = arith.constant 0 : index
    %c0_20 = arith.constant 0 : index
    %27 = vector.load %arg6[%c0_19, %c0_20] : memref<80x32xbf16, #tpu.memory_space<vmem>>, vector<80x32xbf16>
    %cst_21 = arith.constant dense<0.000000e+00> : vector<80x256xf32>
    %28 = tpu.matmul %27, %26, %cst_21 {dimension_numbers = #tpu.dot_dimension_numbers<[1], [0], [0], [1], [0, 0, 1, 1], [], []>} : vector<80x32xbf16>, vector<32x256xbf16>, vector<80x256xf32> -> vector<80x256xf32>
    %c0_22 = arith.constant 0 : index
    %c0_23 = arith.constant 0 : index
    %29 = vector.load %arg11[%c0_22, %c0_23] : memref<80x1xf32, #tpu.memory_space<vmem>>, vector<80x1xf32>
    %30 = vector.broadcast %29 : vector<80x1xf32> to vector<80x256xf32>
    %31 = arith.addf %28, %30 : vector<80x256xf32>
    %cst_24 = arith.constant 0.000000e+00 : f32
    %32 = vector.broadcast %cst_24 : f32 to vector<80x256xf32>
    %33 = arith.maximumf %31, %32 : vector<80x256xf32>
    %34 = arith.truncf %33 : vector<80x256xf32> to vector<80x256xbf16>
    %c0_25 = arith.constant 0 : index
    %c0_26 = arith.constant 0 : index
    %35 = vector.load %arg7[%c0_25, %c0_26] : memref<128x80xbf16, #tpu.memory_space<vmem>>, vector<128x80xbf16>
    %cst_27 = arith.constant dense<0.000000e+00> : vector<128x256xf32>
    %36 = tpu.matmul %35, %34, %cst_27 {dimension_numbers = #tpu.dot_dimension_numbers<[1], [0], [0], [1], [0, 0, 1, 1], [], []>} : vector<128x80xbf16>, vector<80x256xbf16>, vector<128x256xf32> -> vector<128x256xf32>
    %c0_28 = arith.constant 0 : index
    %c0_29 = arith.constant 0 : index
    %37 = vector.load %arg12[%c0_28, %c0_29] : memref<128x1xf32, #tpu.memory_space<vmem>>, vector<128x1xf32>
    %38 = vector.broadcast %37 : vector<128x1xf32> to vector<128x256xf32>
    %39 = arith.addf %36, %38 : vector<128x256xf32>
    %40 = arith.truncf %39 : vector<128x256xf32> to vector<128x256xbf16>
    %c0_30 = arith.constant 0 : index
    %c0_31 = arith.constant 0 : index
    %c0_32 = arith.constant 0 : index
    %41 = vector.load %arg13[%c0_30, %c0_31, %c0_32] : memref<1x128x256xbf16, #tpu.memory_space<vmem>>, vector<1x128x256xbf16>
    %42 = vector.shape_cast %41 : vector<1x128x256xbf16> to vector<128x256xbf16>
    %43 = vector.shape_cast %40 : vector<128x256xbf16> to vector<1x128x256xbf16>
    tpu.vector_store %arg13[%c0_30, %c0_31, %c0_32], %43 {strides = array<i32>} : memref<1x128x256xbf16, #tpu.memory_space<vmem>>, vector<1x128x256xbf16>,
    return
  }
  func.func @transform_0(%arg0: i32, %arg1: i32) -> (i32, i32, i32) {
    %c0_i32 = arith.constant 0 : i32
    %c0_i32_0 = arith.constant 0 : i32
    return %arg0, %c0_i32, %arg1 : i32, i32, i32
  }
  func.func @transform_1(%arg0: i32, %arg1: i32) -> (i32, i32) {
    %c0_i32 = arith.constant 0 : i32
    %c0_i32_0 = arith.constant 0 : i32
    %c0_i32_1 = arith.constant 0 : i32
    return %c0_i32, %c0_i32_0 : i32, i32
  }
  func.func @transform_2(%arg0: i32, %arg1: i32) -> (i32, i32) {
    %c0_i32 = arith.constant 0 : i32
    %c0_i32_0 = arith.constant 0 : i32
    %c0_i32_1 = arith.constant 0 : i32
    return %c0_i32, %c0_i32_0 : i32, i32
  }
  func.func @transform_3(%arg0: i32, %arg1: i32) -> (i32, i32) {
    %c0_i32 = arith.constant 0 : i32
    %c0_i32_0 = arith.constant 0 : i32
    %c0_i32_1 = arith.constant 0 : i32
    return %c0_i32, %c0_i32_0 : i32, i32
  }
  func.func @transform_4(%arg0: i32, %arg1: i32) -> (i32, i32) {
    %c0_i32 = arith.constant 0 : i32
    %c0_i32_0 = arith.constant 0 : i32
    %c0_i32_1 = arith.constant 0 : i32
    return %c0_i32, %c0_i32_0 : i32, i32
  }
  func.func @transform_5(%arg0: i32, %arg1: i32) -> (i32, i32) {
    %c0_i32 = arith.constant 0 : i32
    %c0_i32_0 = arith.constant 0 : i32
    %c0_i32_1 = arith.constant 0 : i32
    return %c0_i32, %c0_i32_0 : i32, i32
  }
  func.func @transform_6(%arg0: i32, %arg1: i32) -> (i32, i32) {
    %c0_i32 = arith.constant 0 : i32
    %c0_i32_0 = arith.constant 0 : i32
    %c0_i32_1 = arith.constant 0 : i32
    return %c0_i32, %c0_i32_0 : i32, i32
  }
  func.func @transform_7(%arg0: i32, %arg1: i32) -> (i32, i32) {
    %c0_i32 = arith.constant 0 : i32
    %c0_i32_0 = arith.constant 0 : i32
    %c0_i32_1 = arith.constant 0 : i32
    return %c0_i32, %c0_i32_0 : i32, i32
  }
  func.func @transform_8(%arg0: i32, %arg1: i32) -> (i32, i32) {
    %c0_i32 = arith.constant 0 : i32
    %c0_i32_0 = arith.constant 0 : i32
    %c0_i32_1 = arith.constant 0 : i32
    return %c0_i32, %c0_i32_0 : i32, i32
  }
  func.func @transform_9(%arg0: i32, %arg1: i32) -> (i32, i32) {
    %c0_i32 = arith.constant 0 : i32
    %c0_i32_0 = arith.constant 0 : i32
    %c0_i32_1 = arith.constant 0 : i32
    return %c0_i32, %c0_i32_0 : i32, i32
  }
  func.func @transform_10(%arg0: i32, %arg1: i32) -> (i32, i32) {
    %c0_i32 = arith.constant 0 : i32
    %c0_i32_0 = arith.constant 0 : i32
    %c0_i32_1 = arith.constant 0 : i32
    return %c0_i32, %c0_i32_0 : i32, i32
  }
  func.func @transform_11(%arg0: i32, %arg1: i32) -> (i32, i32, i32) {
    %c0_i32 = arith.constant 0 : i32
    %c0_i32_0 = arith.constant 0 : i32
    return %arg0, %c0_i32, %arg1 : i32, i32, i32
  }
}

</mosaic_0001>

<bundles_post_ra>
// kernel: featscae_forward.1
= control target key start
LH: loop header
LB: loop body
LE: loop exit
PB: predicated region body
PF: predicated region fallthrough
CT: control target
= control target key end

     0   :  { %s1847_s17 = smov 0   ;;  %s1849_s18 = smov 0   ;;  %s2207_s0 = inlined_call_operand.vmem [shape: f32[2,128,256], index: 0, kind: input, shape index: {}]   ;;  %s2208_s1 = inlined_call_operand.vmem [shape: bf16[80,128], index: 1, kind: input, shape index: {}]   ;;  %s2209_s2 = inlined_call_operand.vmem [shape: bf16[32,80], index: 2, kind: input, shape index: {}]   ;;  %s2210_s3 = inlined_call_operand.vmem [shape: bf16[32,32], index: 3, kind: input, shape index: {}]   ;;  %s2211_s4 = inlined_call_operand.vmem [shape: bf16[80,32], index: 4, kind: input, shape index: {}]   ;;  %s2212_s5 = inlined_call_operand.vmem [shape: bf16[128,80], index: 5, kind: input, shape index: {}]   ;;  %s2213_s6 = inlined_call_operand.vmem [shape: f32[80,1], index: 6, kind: input, shape index: {}]   ;;  %s2214_s7 = inlined_call_operand.vmem [shape: f32[32,1], index: 7, kind: input, shape index: {}]   ;;  %s2215_s8 = inlined_call_operand.vmem [shape: f32[32,1], index: 8, kind: input, shape index: {}]   ;;  %s2216_s9 = inlined_call_operand.vmem [shape: f32[80,1], index: 9, kind: input, shape index: {}]   ;;  %s2217_s10 = inlined_call_operand.vmem [shape: f32[128,1], index: 10, kind: input, shape index: {}]   ;;  %s2218_s11 = inlined_call_operand.vmem [shape: bf16[2,128,256], index: 11, kind: output, shape index: {}]  }
   0x1   :  { %s1851_s19 = smov 0  }
   0x2 LB: > { %s33_s20 = sadd.s32 1, %s1780_s18  ;;  %p1623_p0 = scmp.ge.s32.totalorder %s1784_s19, 1  ;;  %s1784_s19 = sphi %s1851_s19, %s21_s19   ;;  %s1780_s18 = sphi %s1849_s18, %s2220_s18   ;;  %s1776_s17 = sphi %s1847_s17, %s2219_s17  }
   0x3   : > { %p35_p1 = scmp.ge.s32.totalorder %s33_s20, 2  ;;  %p358_p2 = scmp.lt.s32.totalorder %s1784_s19, 3 }
   0x5   : > { %s2222_s20 = smov (%p35_p1, %s33_s20), 0  ;;  %p359_p3 = pnand %p1623_p0, %p358_p2 }
   0x6   : > { %p407_p4 = scmp.lt.s32.totalorder (!%p359_p3), %s1776_s17, 1  ;;  %v1786_v0 = vmov (!%p359_p3), 0   ;;  %v485_v1 = vld [vmem:[%s2213_s6] sm:$0xff] (!%p359_p3)  ;;  %v487_v2 = vld [vmem:[%s2213_s6 + $0x10] sm:$0xff] (!%p359_p3)  ;;  %v486_v3 = vld [vmem:[%s2213_s6 + $0x8] sm:$0xff] (!%p359_p3)  ;;  %vm726_vm0 = vcmask (!%p359_p3), 654336  }
   0x7   : > { %362 = sbr.rel (%p359_p3) target bundleno = 1292 (0x50c), region = 64  ;;  %607 = vmatprep.mubr.bf16.mxu0 (!%p359_p3), %v1786_v0  ;;  %1738 = vset.pattern.permute.xlu0 (!%p359_p3), %v1786_v0  ;;  %v488_v4 = vld [vmem:[%s2213_s6 + $0x18] sm:$0xff] (!%p359_p3)  ;;  %v489_v8 = vld [vmem:[%s2213_s6 + $0x20] sm:$0xff] (!%p359_p3)  ;;  %v490_v31 = vld [vmem:[%s2213_s6 + $0x28] sm:$0xff] (!%p359_p3)  ;;  %vm836_vm1 = vcmask (!%p359_p3), 261120  }
   0x8   : > { %1739 = vset.pattern.permute.xlu1 (!%p359_p3), %v1786_v0  ;;  %765 = vmatprep.mubr.bf16.mxu1 (!%p359_p3), %v1786_v0  ;;  %v491_v32 = vld [vmem:[%s2213_s6 + $0x30] sm:$0xff] (!%p359_p3)  ;;  %v492_v34 = vld [vmem:[%s2213_s6 + $0x38] sm:$0xff] (!%p359_p3)  ;;  %v493_v38 = vld [vmem:[%s2213_s6 + $0x40] sm:$0xff] (!%p359_p3) }
   0x9   : > { %497 = vperm.xlu0 (!%p359_p3), %1738, %v485_v1   ;;  %507 = vperm.xlu1 (!%p359_p3), %1739, %v487_v2   ;;  %v494_v42 = vld [vmem:[%s2213_s6 + $0x48] sm:$0xff] (!%p359_p3)  ;;  %v692_v46 = vld [vmem:[%s2214_s7] sm:$0xff] (!%p359_p3)  ;;  %v694_v54 = vld [vmem:[%s2214_s7 + $0x10] sm:$0xff] (!%p359_p3) }
   0xa   : > { %v693_v50 = vld [vmem:[%s2214_s7 + $0x8] sm:$0xff] (!%p359_p3)  ;;  %v695_v60 = vld [vmem:[%s2214_s7 + $0x18] sm:$0xff] (!%p359_p3)  ;;  %v802_v61 = vld [vmem:[%s2215_s8] sm:$0xff] (!%p359_p3) }
   0xb   : > { %v803_v63 = vld [vmem:[%s2215_s8 + $0x8] sm:$0xff] (!%p359_p3)  ;;  %v804_v1 = vld [vmem:[%s2215_s8 + $0x10] sm:$0xff] (!%p359_p3) }
   0xd   : > { %502 = vperm.xlu0 (!%p359_p3), %1738, %v486_v3   ;;  %512 = vperm.xlu1 (!%p359_p3), %1739, %v488_v4   ;;  %v1740_v3 = vld [vmem:[%s2208_s1] sm:$0xff] (!%p359_p3)   ;;  %v805_v4 = vld [vmem:[%s2215_s8 + $0x18] sm:$0xff] (!%p359_p3) }
   0xe   : > { %s2224_s17 = smov (!%p407_p4, %s1776_s17), 1 }
   0xf   : > { %s1685_s25 = sshll.u32 %s2224_s17, 8  ;;  %s1686_s23 = sshll.u32 %s2224_s17, 7 }
  0x10   : > { %s1884_s30 = scalar_lea.vmem %s2207_s0, %s1685_s25  ;;  %s2164_s26 = scalar_lea.vmem %s2218_s11, %s1686_s23 }
  0x11   : > { %v428_v5 = vld [vmem:[%s1884_s30 + $0x8] sm:$0xff]  ;;  %v430_v6 = vld [vmem:[%s1884_s30 + $0x18] sm:$0xff]  ;;  %v427_v7 = vld [vmem:[%s1884_s30] sm:$0xff]  ;;  %517 = vperm.xlu0 %1738, %v489_v8   ;;  %522 = vperm.xlu1 %1739, %v490_v31  }
  0x12   : > { %v460_v9 = vpack.c.bf16 %v430_v6, %v428_v5  ;;  %v429_v10 = vld [vmem:[%s1884_s30 + $0x10] sm:$0xff]  ;;  %v432_v11 = vld [vmem:[%s1884_s30 + $0x28] sm:$0xff]  ;;  %v434_v12 = vld [vmem:[%s1884_s30 + $0x38] sm:$0xff] }
  0x13   : > { %v459_v13 = vpack.c.bf16 %v429_v10, %v427_v7  ;;  %v462_v14 = vpack.c.bf16 %v434_v12, %v432_v11  ;;  %v431_v15 = vld [vmem:[%s1884_s30 + $0x20] sm:$0xff]  ;;  %v433_v16 = vld [vmem:[%s1884_s30 + $0x30] sm:$0xff]  ;;  %v436_v17 = vld [vmem:[%s1884_s30 + $0x48] sm:$0xff] }
  0x14   : > { %575 = vmatprep.subr.bf16.mxu0 %v460_v9  ;;  %v438_v18 = vld [vmem:[%s1884_s30 + $0x58] sm:$0xff]  ;;  %v461_v19 = vpack.c.bf16 %v433_v16, %v431_v15  ;;  %v435_v21 = vld [vmem:[%s1884_s30 + $0x40] sm:$0xff]  ;;  %v437_v22 = vld [vmem:[%s1884_s30 + $0x50] sm:$0xff] }
  0x15   : > { %576 = vmatpush1.bf16.msra.mxu0 %v459_v13  ;;  %v464_v20 = vpack.c.bf16 %v438_v18, %v436_v17  ;;  %v440_v23 = vld [vmem:[%s1884_s30 + $0x68] sm:$0xff]  ;;  %v442_v24 = vld [vmem:[%s1884_s30 + $0x78] sm:$0xff]  ;;  %v463_v25 = vpack.c.bf16 %v437_v22, %v435_v21  ;;  %v439_v27 = vld [vmem:[%s1884_s30 + $0x60] sm:$0xff]  ;;  %527 = vperm.xlu0 %1738, %v491_v32  }
  0x16   : > { %577 = vmatprep.subr.bf16.mxu0 %v462_v14  ;;  %v466_v26 = vpack.c.bf16 %v442_v24, %v440_v23  ;;  %v441_v28 = vld [vmem:[%s1884_s30 + $0x70] sm:$0xff]  ;;  %v444_v29 = vld [vmem:[%s1884_s30 + $0x88] sm:$0xff]  ;;  %v446_v30 = vld [vmem:[%s1884_s30 + $0x98] sm:$0xff]  ;;  %532 = vperm.xlu1 %1739, %v492_v34  }
  0x17   : > { %v465_v33 = vpack.c.bf16 %v441_v28, %v439_v27  ;;  %v468_v35 = vpack.c.bf16 %v446_v30, %v444_v29  ;;  %v443_v36 = vld [vmem:[%s1884_s30 + $0x80] sm:$0xff]  ;;  %v445_v37 = vld [vmem:[%s1884_s30 + $0x90] sm:$0xff]  ;;  %v448_v39 = vld [vmem:[%s1884_s30 + $0xa8] sm:$0xff] }
  0x18   : > { %v450_v40 = vld [vmem:[%s1884_s30 + $0xb8] sm:$0xff]  ;;  %v467_v41 = vpack.c.bf16 %v445_v37, %v443_v36  ;;  %v447_v44 = vld [vmem:[%s1884_s30 + $0xa0] sm:$0xff]  ;;  %v449_v45 = vld [vmem:[%s1884_s30 + $0xb0] sm:$0xff] }
  0x19   : > { %578 = vmatpush1.bf16.msra.mxu0 %v461_v19  ;;  %537 = vperm.xlu0 %1738, %v493_v38   ;;  %v470_v43 = vpack.c.bf16 %v450_v40, %v448_v39  ;;  %v452_v47 = vld [vmem:[%s1884_s30 + $0xc8] sm:$0xff]  ;;  %v454_v48 = vld [vmem:[%s1884_s30 + $0xd8] sm:$0xff]  ;;  %v469_v49 = vpack.c.bf16 %v449_v45, %v447_v44  ;;  %v451_v52 = vld [vmem:[%s1884_s30 + $0xc0] sm:$0xff] }
  0x1a   : > { %579 = vmatprep.subr.bf16.mxu0 %v464_v20  ;;  %542 = vperm.xlu1 %1739, %v494_v42   ;;  %v472_v51 = vpack.c.bf16 %v454_v48, %v452_v47  ;;  %v453_v53 = vld [vmem:[%s1884_s30 + $0xd0] sm:$0xff]  ;;  %v456_v55 = vld [vmem:[%s1884_s30 + $0xe8] sm:$0xff]  ;;  %v458_v56 = vld [vmem:[%s1884_s30 + $0xf8] sm:$0xff] }
  0x1b   : > { %v455_v57 = vld [vmem:[%s1884_s30 + $0xe0] sm:$0xff]  ;;  %v457_v58 = vld [vmem:[%s1884_s30 + $0xf0] sm:$0xff]  ;;  %v471_v59 = vpack.c.bf16 %v453_v53, %v451_v52  ;;  %v474_v62 = vpack.c.bf16 %v458_v56, %v456_v55  ;;  %v919_v6 = vld [vmem:[%s2216_s9 + $0x8] sm:$0xff] }
  0x1c   : > { %v473_v2 = vpack.c.bf16 %v457_v58, %v455_v57  ;;  %v918_v5 = vld [vmem:[%s2216_s9] sm:$0xff]  ;;  %v920_v7 = vld [vmem:[%s2216_s9 + $0x10] sm:$0xff]  ;;  %v1741_v8 = vld [vmem:[%s2208_s1 + $0x8] sm:$0xff]  }
  0x1d   : > { %580 = vmatpush1.bf16.msra.mxu0 %v463_v25  ;;  %698 = vperm.xlu0 %1738, %v692_v46   ;;  %v921_v9 = vld [vmem:[%s2216_s9 + $0x18] sm:$0xff]  ;;  %v922_v10 = vld [vmem:[%s2216_s9 + $0x20] sm:$0xff]  ;;  %v923_v11 = vld [vmem:[%s2216_s9 + $0x28] sm:$0xff] }
  0x1e   : > { %581 = vmatprep.subr.bf16.mxu0 %v466_v26  ;;  %703 = vperm.xlu1 %1739, %v693_v50   ;;  %v924_v12 = vld [vmem:[%s2216_s9 + $0x30] sm:$0xff]  ;;  %v925_v14 = vld [vmem:[%s2216_s9 + $0x38] sm:$0xff]  ;;  %v926_v15 = vld [vmem:[%s2216_s9 + $0x40] sm:$0xff] }
  0x1f   : > { %v1742_v13 = vld [vmem:[%s2208_s1 + $0x10] sm:$0xff]   ;;  %v927_v16 = vld [vmem:[%s2216_s9 + $0x48] sm:$0xff]  ;;  %v1147_v17 = vld [vmem:[%s2217_s10] sm:$0xff] }
  0x20   : > { %v1743_v18 = vld [vmem:[%s2208_s1 + $0x18] sm:$0xff]   ;;  %v1148_v19 = vld [vmem:[%s2217_s10 + $0x8] sm:$0xff]  ;;  %v1149_v20 = vld [vmem:[%s2217_s10 + $0x10] sm:$0xff] }
  0x21   : > { %582 = vmatpush1.bf16.msra.mxu0 %v465_v33  ;;  %708 = vperm.xlu0 %1738, %v694_v54   ;;  %v1150_v21 = vld [vmem:[%s2217_s10 + $0x18] sm:$0xff]  ;;  %v1151_v22 = vld [vmem:[%s2217_s10 + $0x20] sm:$0xff]  ;;  %v1152_v24 = vld [vmem:[%s2217_s10 + $0x28] sm:$0xff] }
  0x22   : > { %583 = vmatprep.subr.bf16.mxu0 %v468_v35  ;;  %713 = vperm.xlu1 %1739, %v695_v60   ;;  %v1744_v23 = vld [vmem:[%s2208_s1 + $0x20] sm:$0xff]   ;;  %v1153_v25 = vld [vmem:[%s2217_s10 + $0x30] sm:$0xff]  ;;  %v1154_v26 = vld [vmem:[%s2217_s10 + $0x38] sm:$0xff] }
  0x23   : > { %v1155_v27 = vld [vmem:[%s2217_s10 + $0x40] sm:$0xff]  ;;  %v1156_v28 = vld [vmem:[%s2217_s10 + $0x48] sm:$0xff]  ;;  %v1157_v29 = vld [vmem:[%s2217_s10 + $0x50] sm:$0xff] }
  0x24   : > { %v1158_v30 = vld [vmem:[%s2217_s10 + $0x58] sm:$0xff]  ;;  %v1159_v31 = vld [vmem:[%s2217_s10 + $0x60] sm:$0xff]  ;;  %v1160_v32 = vld [vmem:[%s2217_s10 + $0x68] sm:$0xff] }
  0x25   : > { %584 = vmatpush1.bf16.msra.mxu0 %v467_v41  ;;  %808 = vperm.xlu0 %1738, %v802_v61   ;;  %v1161_v33 = vld [vmem:[%s2217_s10 + $0x70] sm:$0xff]  ;;  %v1162_v34 = vld [vmem:[%s2217_s10 + $0x78] sm:$0xff] }
  0x26   : > { %585 = vmatprep.subr.bf16.mxu0 %v470_v43  ;;  %813 = vperm.xlu1 %1739, %v803_v63  }
  0x29   : > { %586 = vmatpush1.bf16.msra.mxu0 %v469_v49  ;;  %818 = vperm.xlu0 %1738, %v804_v1  }
  0x2a   : > { %587 = vmatprep.subr.bf16.mxu0 %v472_v51  ;;  %823 = vperm.xlu1 %1739, %v805_v4  }
  0x2d   : > { %588 = vmatpush1.bf16.msra.mxu0 %v471_v59  ;;  %930 = vperm.xlu0 %1738, %v918_v5  }
  0x2e   : > { %589 = vmatprep.subr.bf16.mxu0 %v474_v62  ;;  %935 = vperm.xlu1 %1739, %v919_v6  }
  0x31   : > { %590 = vmatpush1.bf16.msra.mxu0 %v473_v2  ;;  %940 = vperm.xlu0 %1738, %v920_v7  }
  0x32   : > { %945 = vperm.xlu1 %1739, %v921_v9  }
  0x34   : > { %608 = vmatmul.mubr.bf16.vlgmr.msra.gmra.mrb[0].mxu0 %v1740_v3 }
  0x35   : > { %617 = vmatprep.mubr.bf16.mxu0 %v1786_v0  ;;  %950 = vperm.xlu0 %1738, %v922_v10  }
  0x36   : > { %955 = vperm.xlu1 %1739, %v923_v11  }
  0x39   : > { %960 = vperm.xlu0 %1738, %v924_v12  }
  0x3a   : > { %965 = vperm.xlu1 %1739, %v925_v14  }
  0x3c   : > { %618 = vmatmul.mubr.bf16.gmra.mrb[4].mxu0 %v1741_v8 }
  0x3d   : > { %627 = vmatprep.mubr.bf16.mxu0 %v1786_v0  ;;  %970 = vperm.xlu0 %1738, %v926_v15  }
  0x3e   : > { %975 = vperm.xlu1 %1739, %v927_v16  }
  0x41   : > { %1165 = vperm.xlu0 %1738, %v1147_v17  }
  0x42   : > { %1170 = vperm.xlu1 %1739, %v1148_v19  }
  0x44   : > { %628 = vmatmul.mubr.bf16.gmra.mrb[8].mxu0 %v1742_v13 }
  0x45   : > { %637 = vmatprep.mubr.bf16.mxu0 %v1786_v0  ;;  %1175 = vperm.xlu0 %1738, %v1149_v20  }
  0x46   : > { %1180 = vperm.xlu1 %1739, %v1150_v21  }
  0x49   : > { %1185 = vperm.xlu0 %1738, %v1151_v22  }
  0x4a   : > { %1190 = vperm.xlu1 %1739, %v1152_v24  }
  0x4c   : > { %638 = vmatmul.mubr.bf16.gmra.mrb[12].mxu0 %v1743_v18 }
  0x4d   : > { %647 = vmatprep.mubr.bf16.mxu0 %v1786_v0  ;;  %1195 = vperm.xlu0 %1738, %v1153_v25  }
  0x4e   : > { %1200 = vperm.xlu1 %1739, %v1154_v26  }
  0x51   : > { %1205 = vperm.xlu0 %1738, %v1155_v27  }
  0x52   : > { %1210 = vperm.xlu1 %1739, %v1156_v28  }
  0x54   : > { %648 = vmatmul.mubr.bf16.gmra.mrb[16].mxu0 %v1744_v23 }
  0x55   : > { %1339 = vmatprep.mubr.bf16.mxu0 %v1786_v0  ;;  %1215 = vperm.xlu0 %1738, %v1157_v29  }
  0x56   : > { %1220 = vperm.xlu1 %1739, %v1158_v30  }
  0x59   : > { %1225 = vperm.xlu0 %1738, %v1159_v31  }
  0x5a   : > { %1230 = vperm.xlu1 %1739, %v1160_v32  }
  0x5d   : > { %1235 = vperm.xlu0 %1738, %v1161_v33  }
  0x5e   : > { %1240 = vperm.xlu1 %1739, %v1162_v34  }
  0x88   : > { %v498_v35 = vpop.permute.xlu0 %497  ;;  %v508_v44 = vpop.permute.xlu1 %507 }
  0x8c   : > { %v503_v39 = vpop.permute.xlu0 %502  ;;  %v513_v55 = vpop.permute.xlu1 %512 }
  0x90   : > { %v518_v3 = vpop.permute.xlu0 %517  ;;  %v523_v8 = vpop.permute.xlu1 %522 }
  0x94   : > { %v528_v19 = vpop.permute.xlu0 %527 }
  0x95   : > { %v533_v24 = vpop.permute.xlu1 %532 }
 0x107   : > { %v609_v36 = vpop.f32.mrb[0].mxu0 }
 0x108   : > { %v610_v37 = vadd.f32 %v609_v36, %v498_v35  ;;  %v611_v38 = vpop.f32.mrb[1].mxu0 }
 0x109   : > { %v612_v40 = vadd.f32 %v611_v38, %v498_v35  ;;  %v613_v41 = vpop.f32.mrb[2].mxu0  ;;  %v538_v35 = vpop.permute.xlu0 %537 }
 0x10a   : > { %v614_v42 = vadd.f32 %v613_v41, %v503_v39  ;;  %v615_v43 = vpop.f32.mrb[3].mxu0  ;;  %v658_v46 = vmax.f32 %v610_v37, 0.0 }
 0x10b   : > { %v616_v45 = vadd.f32 %v615_v43, %v503_v39  ;;  %v659_v48 = vmax.f32 %v612_v40, 0.0  ;;  %v543_v40 = vpop.permute.xlu1 %542 }
 0x10c   : > { %v660_v47 = vmax.f32 %v614_v42, 0.0 }
 0x10d   : > { %v661_v49 = vmax.f32 %v616_v45, 0.0 }
 0x10e   : > { %v678_v50 = vpack.c.bf16 %v660_v47, %v658_v46 }
 0x10f   : > { %v619_v51 = vpop.f32.mrb[4].mxu0  ;;  %v679_v52 = vpack.c.bf16 %v661_v49, %v659_v48 }
 0x110   : > { %v620_v53 = vadd.f32 %v619_v51, %v508_v44  ;;  %v621_v54 = vpop.f32.mrb[5].mxu0 }
 0x111   : > { %v622_v56 = vadd.f32 %v621_v54, %v508_v44  ;;  %v623_v57 = vpop.f32.mrb[6].mxu0  ;;  %733 = vmatprep.subr.bf16.mxu1 %v679_v52  ;;  %v1745_v52 = vld [vmem:[%s2209_s2] sm:$0xff]   ;;  %v699_v54 = vpop.permute.xlu0 %698 }
 0x112   : > { %v624_v58 = vadd.f32 %v623_v57, %v513_v55  ;;  %v625_v59 = vpop.f32.mrb[7].mxu0  ;;  %734 = vmatpush1.bf16.msra.mxu1 %v678_v50  ;;  %v662_v61 = vmax.f32 %v620_v53, 0.0  ;;  %v1746_v53 = vld [vmem:[%s2209_s2 + $0x8] sm:$0xff]  }
 0x113   : > { %v626_v60 = vadd.f32 %v625_v59, %v513_v55  ;;  %v663_v63 = vmax.f32 %v622_v56, 0.0 }
 0x114   : > { %v664_v62 = vmax.f32 %v624_v58, 0.0  ;;  %v704_v58 = vpop.permute.xlu1 %703 }
 0x115   : > { %v665_v1 = vmax.f32 %v626_v60, 0.0 }
 0x116   : > { %v680_v2 = vpack.c.bf16 %v664_v62, %v662_v61 }
 0x117   : > { %v681_v4 = vpack.c.bf16 %v665_v1, %v663_v63  ;;  %v629_v5 = vpop.f32.mrb[8].mxu0 }
 0x118   : > { %v630_v6 = vadd.f32 %v629_v5, %v518_v3  ;;  %v631_v7 = vpop.f32.mrb[9].mxu0 }
 0x119   : > { %v632_v9 = vadd.f32 %v631_v7, %v518_v3  ;;  %v633_v10 = vpop.f32.mrb[10].mxu0  ;;  %735 = vmatprep.subr.bf16.mxu1 %v681_v4 }
 0x11a   : > { %v634_v11 = vadd.f32 %v633_v10, %v523_v8  ;;  %v635_v12 = vpop.f32.mrb[11].mxu0  ;;  %736 = vmatpush1.bf16.msra.mxu1 %v680_v2  ;;  %v666_v14 = vmax.f32 %v630_v6, 0.0  ;;  %v709_v6 = vpop.permute.xlu0 %708 }
 0x11b   : > { %v636_v13 = vadd.f32 %v635_v12, %v523_v8  ;;  %v667_v16 = vmax.f32 %v632_v9, 0.0 }
 0x11c   : > { %v668_v15 = vmax.f32 %v634_v11, 0.0  ;;  %v714_v11 = vpop.permute.xlu1 %713 }
 0x11d   : > { %v669_v17 = vmax.f32 %v636_v13, 0.0 }
 0x11e   : > { %v682_v18 = vpack.c.bf16 %v668_v15, %v666_v14 }
 0x11f   : > { %v683_v20 = vpack.c.bf16 %v669_v17, %v667_v16  ;;  %v639_v21 = vpop.f32.mrb[12].mxu0 }
 0x120   : > { %v640_v22 = vadd.f32 %v639_v21, %v528_v19  ;;  %v641_v23 = vpop.f32.mrb[13].mxu0 }
 0x121   : > { %v642_v25 = vadd.f32 %v641_v23, %v528_v19  ;;  %v643_v26 = vpop.f32.mrb[14].mxu0  ;;  %737 = vmatprep.subr.bf16.mxu1 %v683_v20  ;;  %v1747_v23 = vld [vmem:[%s2210_s3] sm:$0xff]  }
 0x122   : > { %v644_v27 = vadd.f32 %v643_v26, %v533_v24  ;;  %v645_v28 = vpop.f32.mrb[15].mxu0  ;;  %738 = vmatpush1.bf16.msra.mxu1 %v682_v18  ;;  %v670_v30 = vmax.f32 %v640_v22, 0.0 }
 0x123   : > { %v646_v29 = vadd.f32 %v645_v28, %v533_v24  ;;  %v671_v32 = vmax.f32 %v642_v25, 0.0  ;;  %v1748_v24 = vld [vmem:[%s2210_s3 + $0x8] sm:$0xff]   ;;  %v809_v25 = vpop.permute.xlu0 %808 }
 0x124   : > { %v672_v31 = vmax.f32 %v644_v27, 0.0 }
 0x125   : > { %v673_v33 = vmax.f32 %v646_v29, 0.0  ;;  %v814_v29 = vpop.permute.xlu1 %813 }
 0x126   : > { %v684_v34 = vpack.c.bf16 %v672_v31, %v670_v30 }
 0x127   : > { %v685_v36 = vpack.c.bf16 %v673_v33, %v671_v32  ;;  %v649_v37 = vpop.f32.mrb[16].mxu0 }
 0x128   : > { %v650_v38 = vadd.f32 %v649_v37, %v538_v35  ;;  %v651_v39 = vpop.f32.mrb[17].mxu0 }
 0x129   : > { %v652_v41 = vadd.f32 %v651_v39, %v538_v35  ;;  %v653_v42 = vpop.f32.mrb[18].mxu0  ;;  %739 = vmatprep.subr.bf16.mxu1 %v685_v36 }
 0x12a   : > { %v654_v43 = vadd.f32 %v653_v42, %v543_v40  ;;  %v655_v44 = vpop.f32.mrb[19].mxu0  ;;  %740 = vmatpush1.bf16.msra.mxu1 %v684_v34  ;;  %v674_v46 = vmax.f32 %v650_v38, 0.0 }
 0x12b   : > { %v656_v45 = vadd.f32 %v655_v44, %v543_v40  ;;  %v675_v48 = vmax.f32 %v652_v41, 0.0  ;;  %v819_v40 = vpop.permute.xlu0 %818 }
 0x12c   : > { %v676_v47 = vmax.f32 %v654_v43, 0.0 }
 0x12d   : > { %v677_v49 = vmax.f32 %v656_v45, 0.0  ;;  %v824_v45 = vpop.permute.xlu1 %823 }
 0x12e   : > { %v686_v50 = vpack.c.bf16 %v676_v47, %v674_v46 }
 0x12f   : > { %v687_v51 = vpack.c.bf16 %v677_v49, %v675_v48 }
 0x131   : > { %741 = vmatprep.subr.bf16.mxu1 %v687_v51 }
 0x132   : > { %742 = vmatpush1.bf16.msra.mxu1 %v686_v50 }
 0x135   : > { %1635 = vmatmul.mubr.msk.bf16.vlgmr.msra.gmra.mrb[0].mxu1 %vm726_vm0, %v1745_v52 }
 0x136   : > { %775 = vmatprep.mubr.bf16.mxu1 %v1786_v0 }
 0x13d   : > { %1636 = vmatmul.mubr.msk.bf16.gmra.mrb[4].mxu1 %vm726_vm0, %v1746_v53 }
 0x13e   : > { %875 = vmatprep.mubr.bf16.mxu1 %v1786_v0 }
 0x208   : > { %v767_v55 = vpop.f32.mrb[0].mxu1 }
 0x209   : > { %v768_v56 = vadd.f32 %v767_v55, %v699_v54  ;;  %v769_v57 = vpop.f32.mrb[1].mxu1 }
 0x20a   : > { %v770_v59 = vadd.f32 %v769_v57, %v699_v54  ;;  %v771_v60 = vpop.f32.mrb[2].mxu1  ;;  %v1749_v57 = vld [vmem:[%s2211_s4] sm:$0xff]  }
 0x20b   : > { %v772_v61 = vadd.f32 %v771_v60, %v704_v58  ;;  %v773_v62 = vpop.f32.mrb[3].mxu1  ;;  %v786_v1 = vmax.f32 %v768_v56, 0.0  ;;  %v1752_v60 = vld [vmem:[%s2211_s4 + $0x18] sm:$0xff]  }
 0x20c   : > { %v774_v63 = vadd.f32 %v773_v62, %v704_v58  ;;  %v787_v3 = vmax.f32 %v770_v59, 0.0  ;;  %v1750_v58 = vld [vmem:[%s2211_s4 + $0x8] sm:$0xff]   ;;  %v1751_v59 = vld [vmem:[%s2211_s4 + $0x10] sm:$0xff]   ;;  %v931_v62 = vpop.permute.xlu0 %930 }
 0x20d   : > { %v788_v2 = vmax.f32 %v772_v61, 0.0  ;;  %v1753_v61 = vld [vmem:[%s2211_s4 + $0x20] sm:$0xff]  }
 0x20e   : > { %v789_v4 = vmax.f32 %v774_v63, 0.0 }
 0x20f   : > { %v794_v5 = vpack.c.bf16 %v788_v2, %v786_v1 }
 0x210   : > { %v795_v7 = vpack.c.bf16 %v789_v4, %v787_v3  ;;  %v777_v8 = vpop.f32.mrb[4].mxu1  ;;  %v936_v3 = vpop.permute.xlu1 %935 }
 0x211   : > { %v778_v9 = vadd.f32 %v777_v8, %v709_v6  ;;  %v779_v10 = vpop.f32.mrb[5].mxu1 }
 0x212   : > { %v780_v12 = vadd.f32 %v779_v10, %v709_v6  ;;  %v781_v13 = vpop.f32.mrb[6].mxu1  ;;  %843 = vmatprep.subr.bf16.mxu1 %v795_v7 }
 0x213   : > { %v782_v14 = vadd.f32 %v781_v13, %v714_v11  ;;  %v783_v15 = vpop.f32.mrb[7].mxu1  ;;  %844 = vmatpush1.bf16.msra.mxu1 %v794_v5  ;;  %v790_v17 = vmax.f32 %v778_v9, 0.0 }
 0x214   : > { %v784_v16 = vadd.f32 %v783_v15, %v714_v11  ;;  %v791_v19 = vmax.f32 %v780_v12, 0.0 }
 0x215   : > { %v792_v18 = vmax.f32 %v782_v14, 0.0  ;;  %v941_v14 = vpop.permute.xlu0 %940 }
 0x216   : > { %v793_v20 = vmax.f32 %v784_v16, 0.0 }
 0x217   : > { %v796_v21 = vpack.c.bf16 %v792_v18, %v790_v17 }
 0x218   : > { %v797_v22 = vpack.c.bf16 %v793_v20, %v791_v19  ;;  %v946_v19 = vpop.permute.xlu1 %945 }
 0x21a   : > { %845 = vmatprep.subr.bf16.mxu1 %v797_v22 }
 0x21b   : > { %846 = vmatpush1.bf16.msra.mxu1 %v796_v21 }
 0x21e   : > { %1639 = vmatmul.mubr.msk.bf16.vlgmr.msra.gmra.mrb[8].mxu1 %vm836_vm1, %v1747_v23 }
 0x21f   : > { %885 = vmatprep.mubr.bf16.mxu1 %v1786_v0 }
 0x226   : > { %1640 = vmatmul.mubr.msk.bf16.gmra.mrb[12].mxu1 %vm836_vm1, %v1748_v24 }
 0x227   : > { %1050 = vmatprep.mubr.bf16.mxu1 %v1786_v0 }
 0x2f1   : > { %v877_v26 = vpop.f32.mrb[8].mxu1 }
 0x2f2   : > { %v878_v27 = vadd.f32 %v877_v26, %v809_v25  ;;  %v879_v28 = vpop.f32.mrb[9].mxu1 }
 0x2f3   : > { %v880_v30 = vadd.f32 %v879_v28, %v809_v25  ;;  %v881_v31 = vpop.f32.mrb[10].mxu1 }
 0x2f4   : > { %v882_v32 = vadd.f32 %v881_v31, %v814_v29  ;;  %v883_v33 = vpop.f32.mrb[11].mxu1  ;;  %v896_v35 = vmax.f32 %v878_v27, 0.0 }
 0x2f5   : > { %v884_v34 = vadd.f32 %v883_v33, %v814_v29  ;;  %v897_v37 = vmax.f32 %v880_v30, 0.0  ;;  %v951_v30 = vpop.permute.xlu0 %950 }
 0x2f6   : > { %v898_v36 = vmax.f32 %v882_v32, 0.0 }
 0x2f7   : > { %v899_v38 = vmax.f32 %v884_v34, 0.0 }
 0x2f8   : > { %v904_v39 = vpack.c.bf16 %v898_v36, %v896_v35  ;;  %v956_v35 = vpop.permute.xlu1 %955 }
 0x2f9   : > { %v905_v41 = vpack.c.bf16 %v899_v38, %v897_v37  ;;  %v887_v42 = vpop.f32.mrb[12].mxu1 }
 0x2fa   : > { %v888_v43 = vadd.f32 %v887_v42, %v819_v40  ;;  %v889_v44 = vpop.f32.mrb[13].mxu1 }
 0x2fb   : > { %v890_v46 = vadd.f32 %v889_v44, %v819_v40  ;;  %v891_v47 = vpop.f32.mrb[14].mxu1  ;;  %1018 = vmatprep.subr.bf16.mxu1 %v905_v41 }
 0x2fc   : > { %v892_v48 = vadd.f32 %v891_v47, %v824_v45  ;;  %v893_v49 = vpop.f32.mrb[15].mxu1  ;;  %1019 = vmatpush1.bf16.msra.mxu1 %v904_v39  ;;  %v900_v51 = vmax.f32 %v888_v43, 0.0 }
 0x2fd   : > { %v894_v50 = vadd.f32 %v893_v49, %v824_v45  ;;  %v901_v53 = vmax.f32 %v890_v46, 0.0  ;;  %v961_v46 = vpop.permute.xlu0 %960 }
 0x2fe   : > { %v902_v52 = vmax.f32 %v892_v48, 0.0 }
 0x2ff   : > { %v903_v54 = vmax.f32 %v894_v50, 0.0 }
 0x300   : > { %v906_v55 = vpack.c.bf16 %v902_v52, %v900_v51  ;;  %v966_v51 = vpop.permute.xlu1 %965 }
 0x301   : > { %v907_v56 = vpack.c.bf16 %v903_v54, %v901_v53 }
 0x303   : > { %1020 = vmatprep.subr.bf16.mxu1 %v907_v56 }
 0x304   : > { %1021 = vmatpush1.bf16.msra.mxu1 %v906_v55 }
 0x307   : > { %1646 = vmatmul.mubr.msk.bf16.vlgmr.msra.gmra.mrb[16].mxu1 %vm836_vm1, %v1749_v57 }
 0x308   : > { %1060 = vmatprep.mubr.bf16.mxu1 %v1786_v0 }
 0x30f   : > { %1647 = vmatmul.mubr.msk.bf16.gmra.mrb[20].mxu1 %vm836_vm1, %v1750_v58 }
 0x310   : > { %1070 = vmatprep.mubr.bf16.mxu1 %v1786_v0 }
 0x317   : > { %1648 = vmatmul.mubr.msk.bf16.gmra.mrb[24].mxu1 %vm836_vm1, %v1751_v59 }
 0x318   : > { %1080 = vmatprep.mubr.bf16.mxu1 %v1786_v0 }
 0x31f   : > { %1649 = vmatmul.mubr.msk.bf16.gmra.mrb[28].mxu1 %vm836_vm1, %v1752_v60 }
 0x320   : > { %1090 = vmatprep.mubr.bf16.mxu1 %v1786_v0 }
 0x327   : > { %1650 = vmatmul.mubr.msk.bf16.gmra.mrb[32].mxu1 %vm836_vm1, %v1753_v61 }
 0x328   : > { %1399 = vmatprep.mubr.bf16.mxu1 %v1786_v0 }
 0x3da   : > { %v1052_v63 = vpop.f32.mrb[16].mxu1 }
 0x3db   : > { %v1053_v1 = vadd.f32 %v1052_v63, %v931_v62  ;;  %v1054_v2 = vpop.f32.mrb[17].mxu1 }
 0x3dc   : > { %v1055_v4 = vadd.f32 %v1054_v2, %v931_v62  ;;  %v1056_v5 = vpop.f32.mrb[18].mxu1  ;;  %v971_v62 = vpop.permute.xlu0 %970 }
 0x3dd   : > { %v1057_v6 = vadd.f32 %v1056_v5, %v936_v3  ;;  %v1058_v7 = vpop.f32.mrb[19].mxu1  ;;  %v1101_v9 = vmax.f32 %v1053_v1, 0.0 }
 0x3de   : > { %v1059_v8 = vadd.f32 %v1058_v7, %v936_v3  ;;  %v1102_v11 = vmax.f32 %v1055_v4, 0.0  ;;  %v976_v4 = vpop.permute.xlu1 %975 }
 0x3df   : > { %v1103_v10 = vmax.f32 %v1057_v6, 0.0 }
 0x3e0   : > { %v1104_v12 = vmax.f32 %v1059_v8, 0.0 }
 0x3e1   : > { %v1121_v13 = vpack.c.bf16 %v1103_v10, %v1101_v9 }
 0x3e2   : > { %v1122_v15 = vpack.c.bf16 %v1104_v12, %v1102_v11  ;;  %v1062_v16 = vpop.f32.mrb[20].mxu1 }
 0x3e3   : > { %v1063_v17 = vadd.f32 %v1062_v16, %v941_v14  ;;  %v1064_v18 = vpop.f32.mrb[21].mxu1  ;;  %v1754_v16 = vld [vmem:[%s2212_s5] sm:$0xff]  }
 0x3e4   : > { %v1065_v20 = vadd.f32 %v1064_v18, %v941_v14  ;;  %v1066_v21 = vpop.f32.mrb[22].mxu1  ;;  %1307 = vmatprep.subr.bf16.mxu0 %v1122_v15  ;;  %1703 = vmatprep.subr.bf16.mxu1 %v1122_v15  ;;  %v1756_v18 = vld [vmem:[%s2212_s5 + $0x8] sm:$0xff]  }
 0x3e5   : > { %v1067_v22 = vadd.f32 %v1066_v21, %v946_v19  ;;  %v1068_v23 = vpop.f32.mrb[23].mxu1  ;;  %1308 = vmatpush1.bf16.msra.mxu0 %v1121_v13  ;;  %1708 = vmatpush1.bf16.msra.mxu1 %v1121_v13  ;;  %v1105_v25 = vmax.f32 %v1063_v17, 0.0  ;;  %v1755_v17 = vld [vmem:[%s2212_s5 + $0x30] sm:$0xff]   ;;  %v1759_v21 = vld [vmem:[%s2212_s5 + $0x18] sm:$0xff]  }
 0x3e6   : > { %v1069_v24 = vadd.f32 %v1068_v23, %v946_v19  ;;  %v1106_v27 = vmax.f32 %v1065_v20, 0.0  ;;  %v1757_v19 = vld [vmem:[%s2212_s5 + $0x38] sm:$0xff]   ;;  %v1758_v20 = vld [vmem:[%s2212_s5 + $0x10] sm:$0xff]   ;;  %v1761_v23 = vld [vmem:[%s2212_s5 + $0x28] sm:$0xff]  }
 0x3e7   : > { %v1107_v26 = vmax.f32 %v1067_v22, 0.0  ;;  %v1760_v22 = vld [vmem:[%s2212_s5 + $0x20] sm:$0xff]  }
 0x3e8   : > { %v1108_v28 = vmax.f32 %v1069_v24, 0.0  ;;  %v1166_v24 = vpop.permute.xlu0 %1165 }
 0x3e9   : > { %v1123_v29 = vpack.c.bf16 %v1107_v26, %v1105_v25  ;;  %v1171_v25 = vpop.permute.xlu1 %1170 }
 0x3ea   : > { %v1124_v31 = vpack.c.bf16 %v1108_v28, %v1106_v27  ;;  %v1072_v32 = vpop.f32.mrb[24].mxu1 }
 0x3eb   : > { %v1073_v33 = vadd.f32 %v1072_v32, %v951_v30  ;;  %v1074_v34 = vpop.f32.mrb[25].mxu1 }
 0x3ec   : > { %v1075_v36 = vadd.f32 %v1074_v34, %v951_v30  ;;  %v1076_v37 = vpop.f32.mrb[26].mxu1  ;;  %1309 = vmatprep.subr.bf16.mxu0 %v1124_v31  ;;  %1704 = vmatprep.subr.bf16.mxu1 %v1124_v31  ;;  %v1176_v26 = vpop.permute.xlu0 %1175 }
 0x3ed   : > { %v1077_v38 = vadd.f32 %v1076_v37, %v956_v35  ;;  %v1078_v39 = vpop.f32.mrb[27].mxu1  ;;  %1310 = vmatpush1.bf16.msra.mxu0 %v1123_v29  ;;  %1709 = vmatpush1.bf16.msra.mxu1 %v1123_v29  ;;  %v1109_v41 = vmax.f32 %v1073_v33, 0.0  ;;  %v1181_v27 = vpop.permute.xlu1 %1180 }
 0x3ee   : > { %v1079_v40 = vadd.f32 %v1078_v39, %v956_v35  ;;  %v1110_v43 = vmax.f32 %v1075_v36, 0.0 }
 0x3ef   : > { %v1111_v42 = vmax.f32 %v1077_v38, 0.0 }
 0x3f0   : > { %v1112_v44 = vmax.f32 %v1079_v40, 0.0  ;;  %v2144_v28 = vpop.permute.xlu0 %1185 }
 0x3f1   : > { %v1125_v45 = vpack.c.bf16 %v1111_v42, %v1109_v41  ;;  %v2146_v29 = vpop.permute.xlu1 %1190 }
 0x3f2   : > { %v1126_v47 = vpack.c.bf16 %v1112_v44, %v1110_v43  ;;  %v1082_v48 = vpop.f32.mrb[28].mxu1 }
 0x3f3   : > { %v1083_v49 = vadd.f32 %v1082_v48, %v961_v46  ;;  %v1084_v50 = vpop.f32.mrb[29].mxu1 }
 0x3f4   : > { %v1085_v52 = vadd.f32 %v1084_v50, %v961_v46  ;;  %v1086_v53 = vpop.f32.mrb[30].mxu1  ;;  %1311 = vmatprep.subr.bf16.mxu0 %v1126_v47  ;;  %1705 = vmatprep.subr.bf16.mxu1 %v1126_v47  ;;  %v2148_v30 = vpop.permute.xlu0 %1195 }
 0x3f5   : > { %v1087_v54 = vadd.f32 %v1086_v53, %v966_v51  ;;  %v1088_v55 = vpop.f32.mrb[31].mxu1  ;;  %1312 = vmatpush1.bf16.msra.mxu0 %v1125_v45  ;;  %1710 = vmatpush1.bf16.msra.mxu1 %v1125_v45  ;;  %v1113_v57 = vmax.f32 %v1083_v49, 0.0  ;;  %v2150_v31 = vpop.permute.xlu1 %1200 }
 0x3f6   : > { %v1089_v56 = vadd.f32 %v1088_v55, %v966_v51  ;;  %v1114_v59 = vmax.f32 %v1085_v52, 0.0 }
 0x3f7   : > { %v1115_v58 = vmax.f32 %v1087_v54, 0.0 }
 0x3f8   : > { %v1116_v60 = vmax.f32 %v1089_v56, 0.0 }
 0x3f9   : > { %v1127_v61 = vpack.c.bf16 %v1115_v58, %v1113_v57  ;;  %v2154_v32 = vpop.permute.xlu1 %1210 }
 0x3fa   : > { %v1128_v63 = vpack.c.bf16 %v1116_v60, %v1114_v59  ;;  %v1092_v1 = vpop.f32.mrb[32].mxu1 }
 0x3fb   : > { %v1093_v2 = vadd.f32 %v1092_v1, %v971_v62  ;;  %v1094_v3 = vpop.f32.mrb[33].mxu1 }
 0x3fc   : > { %v1095_v5 = vadd.f32 %v1094_v3, %v971_v62  ;;  %v1096_v6 = vpop.f32.mrb[34].mxu1  ;;  %1313 = vmatprep.subr.bf16.mxu0 %v1128_v63  ;;  %1706 = vmatprep.subr.bf16.mxu1 %v1128_v63 }
 0x3fd   : > { %v1097_v7 = vadd.f32 %v1096_v6, %v976_v4  ;;  %v1098_v8 = vpop.f32.mrb[35].mxu1  ;;  %1314 = vmatpush1.bf16.msra.mxu0 %v1127_v61  ;;  %1711 = vmatpush1.bf16.msra.mxu1 %v1127_v61  ;;  %v1117_v10 = vmax.f32 %v1093_v2, 0.0  ;;  %v2158_v34 = vpop.permute.xlu1 %1220 }
 0x3fe   : > { %v1099_v9 = vadd.f32 %v1098_v8, %v976_v4  ;;  %v1118_v12 = vmax.f32 %v1095_v5, 0.0 }
 0x3ff   : > { %v1119_v11 = vmax.f32 %v1097_v7, 0.0 }
 0x400   : > { %v1120_v13 = vmax.f32 %v1099_v9, 0.0 }
 0x401   : > { %v1129_v14 = vpack.c.bf16 %v1119_v11, %v1117_v10  ;;  %v1231_v36 = vpop.permute.xlu1 %1230 }
 0x402   : > { %v1130_v15 = vpack.c.bf16 %v1120_v13, %v1118_v12 }
 0x404   : > { %1315 = vmatprep.subr.bf16.mxu0 %v1130_v15  ;;  %1707 = vmatprep.subr.bf16.mxu1 %v1130_v15 }
 0x405   : > { %1316 = vmatpush1.bf16.msra.mxu0 %v1129_v14  ;;  %1712 = vmatpush1.bf16.msra.mxu1 %v1129_v14  ;;  %v1241_v58 = vpop.permute.xlu1 %1240 }
 0x408   : > { %1659 = vmatmul.mubr.msk.bf16.vlgmr.msra.gmra.mrb[20].mxu0 %vm726_vm0, %v1754_v16  ;;  %1665 = vmatmul.mubr.msk.bf16.vlgmr.msra.gmra.mrb[36].mxu1 %vm726_vm0, %v1755_v17 }
 0x409   : > { %1349 = vmatprep.mubr.bf16.mxu0 %v1786_v0  ;;  %1409 = vmatprep.mubr.bf16.mxu1 %v1786_v0 }
 0x410   : > { %1660 = vmatmul.mubr.msk.bf16.gmra.mrb[24].mxu0 %vm726_vm0, %v1756_v18  ;;  %1666 = vmatmul.mubr.msk.bf16.gmra.mrb[40].mxu1 %vm726_vm0, %v1757_v19 }
 0x411   : > { %1359 = vmatprep.mubr.bf16.mxu0 %v1786_v0 }
 0x418   : > { %1661 = vmatmul.mubr.msk.bf16.gmra.mrb[28].mxu0 %vm726_vm0, %v1758_v20 }
 0x419   : > { %1369 = vmatprep.mubr.bf16.mxu0 %v1786_v0 }
 0x420   : > { %1662 = vmatmul.mubr.msk.bf16.gmra.mrb[32].mxu0 %vm726_vm0, %v1759_v21 }
 0x421   : > { %1379 = vmatprep.mubr.bf16.mxu0 %v1786_v0 }
 0x428   : > { %1663 = vmatmul.mubr.msk.bf16.gmra.mrb[36].mxu0 %vm726_vm0, %v1760_v22 }
 0x429   : > { %1389 = vmatprep.mubr.bf16.mxu0 %v1786_v0  ;;  %v2152_v0 = vpop.permute.xlu0 %1205 }
 0x42d   : > { %v2156_v33 = vpop.permute.xlu0 %1215 }
 0x430   : > { %1664 = vmatmul.mubr.msk.bf16.gmra.mrb[40].mxu0 %vm726_vm0, %v1761_v23 }
 0x431   : > { %v1226_v35 = vpop.permute.xlu0 %1225 }
 0x435   : > { %v1236_v57 = vpop.permute.xlu0 %1235 }
 0x4db   : > { %v1341_v37 = vpop.f32.mrb[20].mxu0  ;;  %v1401_v38 = vpop.f32.mrb[36].mxu1 }
 0x4dc   : > { %v1342_v39 = vadd.f32 %v1341_v37, %v1166_v24  ;;  %v1402_v40 = vadd.f32 %v1401_v38, %v1226_v35  ;;  %v1343_v41 = vpop.f32.mrb[21].mxu0  ;;  %v1403_v42 = vpop.f32.mrb[37].mxu1 }
 0x4dd   : > { %v1344_v43 = vadd.f32 %v1343_v41, %v1166_v24  ;;  %v1404_v44 = vadd.f32 %v1403_v42, %v1226_v35  ;;  %v1345_v45 = vpop.f32.mrb[22].mxu0  ;;  %v1405_v46 = vpop.f32.mrb[38].mxu1 }
 0x4de   : > { %v1346_v47 = vadd.f32 %v1345_v45, %v1171_v25  ;;  %v1406_v48 = vadd.f32 %v1405_v46, %v1231_v36  ;;  %v1347_v49 = vpop.f32.mrb[23].mxu0  ;;  %v1407_v50 = vpop.f32.mrb[39].mxu1 }
 0x4df   : > { %v1687_v51 = vpack.c.bf16 %v1344_v43, %v1342_v39  ;;  %v1699_v52 = vpack.c.bf16 %v1404_v44, %v1402_v40  ;;  %v1348_v53 = vadd.f32 %v1347_v49, %v1171_v25  ;;  %v1408_v54 = vadd.f32 %v1407_v50, %v1231_v36 }
 0x4e1   : > { %1516 = vst [vmem:[%s2164_s26] sm:$0xff] %v1687_v51  ;;  %1528 = vst [vmem:[%s2164_s26 + $0x60] sm:$0xff] %v1699_v52  ;;  %v1688_v55 = vpack.c.bf16 %v1348_v53, %v1346_v47  ;;  %v1700_v56 = vpack.c.bf16 %v1408_v54, %v1406_v48 }
 0x4e3   : > { %1517 = vst [vmem:[%s2164_s26 + $0x8] sm:$0xff] %v1688_v55  ;;  %1529 = vst [vmem:[%s2164_s26 + $0x68] sm:$0xff] %v1700_v56  ;;  %v1351_v59 = vpop.f32.mrb[24].mxu0  ;;  %v1411_v60 = vpop.f32.mrb[40].mxu1 }
 0x4e4   : > { %v1352_v61 = vadd.f32 %v1351_v59, %v1176_v26  ;;  %v1412_v62 = vadd.f32 %v1411_v60, %v1236_v57  ;;  %v1353_v63 = vpop.f32.mrb[25].mxu0  ;;  %v1413_v1 = vpop.f32.mrb[41].mxu1 }
 0x4e5   : > { %v1354_v2 = vadd.f32 %v1353_v63, %v1176_v26  ;;  %v1414_v3 = vadd.f32 %v1413_v1, %v1236_v57  ;;  %v1355_v4 = vpop.f32.mrb[26].mxu0  ;;  %v1415_v5 = vpop.f32.mrb[42].mxu1 }
 0x4e6   : > { %v1356_v6 = vadd.f32 %v1355_v4, %v1181_v27  ;;  %v1416_v7 = vadd.f32 %v1415_v5, %v1241_v58  ;;  %v1357_v8 = vpop.f32.mrb[27].mxu0  ;;  %v1417_v9 = vpop.f32.mrb[43].mxu1 }
 0x4e7   : > { %v1689_v10 = vpack.c.bf16 %v1354_v2, %v1352_v61  ;;  %v1701_v11 = vpack.c.bf16 %v1414_v3, %v1412_v62  ;;  %v1358_v12 = vadd.f32 %v1357_v8, %v1181_v27  ;;  %v1418_v13 = vadd.f32 %v1417_v9, %v1241_v58 }
 0x4e9   : > { %1518 = vst [vmem:[%s2164_s26 + $0x10] sm:$0xff] %v1689_v10  ;;  %1530 = vst [vmem:[%s2164_s26 + $0x70] sm:$0xff] %v1701_v11  ;;  %v1690_v14 = vpack.c.bf16 %v1358_v12, %v1356_v6  ;;  %v1702_v15 = vpack.c.bf16 %v1418_v13, %v1416_v7 }
 0x4eb   : > { %1519 = vst [vmem:[%s2164_s26 + $0x18] sm:$0xff] %v1690_v14  ;;  %1531 = vst [vmem:[%s2164_s26 + $0x78] sm:$0xff] %v1702_v15  ;;  %v1361_v16 = vpop.f32.mrb[28].mxu0 }
 0x4ec   : > { %v1362_v17 = vadd.f32 %v1361_v16, %v2144_v28  ;;  %v1363_v18 = vpop.f32.mrb[29].mxu0 }
 0x4ed   : > { %v1364_v19 = vadd.f32 %v1363_v18, %v2144_v28  ;;  %v1365_v20 = vpop.f32.mrb[30].mxu0 }
 0x4ee   : > { %v1366_v21 = vadd.f32 %v1365_v20, %v2146_v29  ;;  %v1367_v22 = vpop.f32.mrb[31].mxu0 }
 0x4ef   : > { %v1691_v23 = vpack.c.bf16 %v1364_v19, %v1362_v17  ;;  %v1368_v24 = vadd.f32 %v1367_v22, %v2146_v29 }
 0x4f1   : > { %1520 = vst [vmem:[%s2164_s26 + $0x20] sm:$0xff] %v1691_v23  ;;  %v1692_v25 = vpack.c.bf16 %v1368_v24, %v1366_v21 }
 0x4f3   : > { %1521 = vst [vmem:[%s2164_s26 + $0x28] sm:$0xff] %v1692_v25  ;;  %v1371_v26 = vpop.f32.mrb[32].mxu0 }
 0x4f4   : > { %v1372_v27 = vadd.f32 %v1371_v26, %v2148_v30  ;;  %v1373_v35 = vpop.f32.mrb[33].mxu0 }
 0x4f5   : > { %v1374_v36 = vadd.f32 %v1373_v35, %v2148_v30  ;;  %v1375_v37 = vpop.f32.mrb[34].mxu0 }
 0x4f6   : > { %v1376_v28 = vadd.f32 %v1375_v37, %v2150_v31  ;;  %v1377_v38 = vpop.f32.mrb[35].mxu0 }
 0x4f7   : > { %v1693_v39 = vpack.c.bf16 %v1374_v36, %v1372_v27  ;;  %v1378_v40 = vadd.f32 %v1377_v38, %v2150_v31 }
 0x4f9   : > { %1522 = vst [vmem:[%s2164_s26 + $0x30] sm:$0xff] %v1693_v39  ;;  %v1694_v29 = vpack.c.bf16 %v1378_v40, %v1376_v28 }
 0x4fb   : > { %1523 = vst [vmem:[%s2164_s26 + $0x38] sm:$0xff] %v1694_v29  ;;  %v1381_v41 = vpop.f32.mrb[36].mxu0 }
 0x4fc   : > { %v1382_v42 = vadd.f32 %v1381_v41, %v2152_v0  ;;  %v1383_v43 = vpop.f32.mrb[37].mxu0 }
 0x4fd   : > { %v1384_v44 = vadd.f32 %v1383_v43, %v2152_v0  ;;  %v1385_v45 = vpop.f32.mrb[38].mxu0 }
 0x4fe   : > { %v1386_v30 = vadd.f32 %v1385_v45, %v2154_v32  ;;  %v1387_v46 = vpop.f32.mrb[39].mxu0 }
 0x4ff   : > { %v1695_v47 = vpack.c.bf16 %v1384_v44, %v1382_v42  ;;  %v1388_v48 = vadd.f32 %v1387_v46, %v2154_v32 }
 0x501   : > { %1524 = vst [vmem:[%s2164_s26 + $0x40] sm:$0xff] %v1695_v47  ;;  %v1696_v31 = vpack.c.bf16 %v1388_v48, %v1386_v30 }
 0x503   : > { %1525 = vst [vmem:[%s2164_s26 + $0x48] sm:$0xff] %v1696_v31  ;;  %v1391_v49 = vpop.f32.mrb[40].mxu0 }
 0x504   : > { %v1392_v50 = vadd.f32 %v1391_v49, %v2156_v33  ;;  %v1393_v51 = vpop.f32.mrb[41].mxu0 }
 0x505   : > { %v1394_v52 = vadd.f32 %v1393_v51, %v2156_v33  ;;  %v1395_v53 = vpop.f32.mrb[42].mxu0 }
 0x506   : > { %v1396_v0 = vadd.f32 %v1395_v53, %v2158_v34  ;;  %v1397_v54 = vpop.f32.mrb[43].mxu0 }
 0x507   : > { %v1697_v55 = vpack.c.bf16 %v1394_v52, %v1392_v50  ;;  %v1398_v56 = vadd.f32 %v1397_v54, %v2158_v34 }
 0x509   : > { %1526 = vst [vmem:[%s2164_s26 + $0x50] sm:$0xff] %v1697_v55  ;;  %v1698_v57 = vpack.c.bf16 %v1398_v56, %v1396_v0 }
 0x50b   : > { %1527 = vst [vmem:[%s2164_s26 + $0x58] sm:$0xff] %v1698_v57 }
 0x50c PF: > { %s21_s19 = sadd.s32 1, %s1784_s19   ;;  %s2219_s17 = smov %s1780_s18 }
 0x50d   : > { %p18_p5 = scmp.ge.s32.totalorder %s21_s19, 4   ;;  %s2220_s18 = smov %s2222_s20 }
 0x50f   :  { %20 = sbr.rel (!%p18_p5) target bundleno = 2 (0x2), region = 94 }

</bundles_post_ra>
